<compile_context>
chip_gen: v7x
topology: tpu7x:2x2x1
jax: 0.10.0
libtpu: 0.0.40
codegen_flags: <defaults>
</compile_context>

<pallas_src>
import jax
import jax.numpy as jnp
from jax.experimental import pallas as pl
from jax.experimental.pallas import tpu as pltpu


_MIB = 1024 * 1024
_DEFAULT_VMEM_BUDGET = 40 * _MIB      # plan target; safe on v7x (64 MiB/TC VMEM)


# ---------------------------------------------------------------------------
# Kernels
# ---------------------------------------------------------------------------

def _ffn_kernel_resident(x_ref, w1_ref, b1_ref, w2_ref, b2_ref, o_ref):
    """o = relu(x @ W1 + b1) @ W2 + b2 with W1/W2/b1/b2 resident in VMEM.

    Operands stay in their native dtype (bf16 inputs keep the fast MXU path);
    the MXU accumulates in f32 via preferred_element_type; bias add / ReLU run
    in f32 on the VPU.
    """
    h = jnp.dot(x_ref[...], w1_ref[...], preferred_element_type=jnp.float32)
    h = jnp.maximum(h + b1_ref[...].astype(jnp.float32), 0.0)
    # TODO(synk): nn.Dropout(p=0.1) omitted — forward matches eval mode
    # (dropout is the identity at inference time).
    y = jnp.dot(h.astype(w2_ref.dtype), w2_ref[...],
                preferred_element_type=jnp.float32)
    o_ref[...] = (y + b2_ref[...].astype(jnp.float32)).astype(o_ref.dtype)


def _ffn_kernel_ff_tiled(x_ref, w1_ref, b1_ref, w2_ref, b2_ref, o_ref, acc_ref):
    """d_ff-tiled fallback: stream W1/W2 panels along d_ff (reduction axis) and
    accumulate the second matmul into an f32 VMEM scratch.

    Zero-padded d_ff columns (W1/b1) and rows (W2) contribute exactly 0, so
    padding d_ff up to a multiple of the panel width is safe.
    """
    k = pl.program_id(1)

    @pl.when(k == 0)
    def _():
        acc_ref[...] = jnp.zeros_like(acc_ref)

    h = jnp.dot(x_ref[...], w1_ref[...], preferred_element_type=jnp.float32)
    h = jnp.maximum(h + b1_ref[...].astype(jnp.float32), 0.0)
    # TODO(synk): dropout omitted (eval-mode forward).
    acc_ref[...] += jnp.dot(h.astype(w2_ref.dtype), w2_ref[...],
                            preferred_element_type=jnp.float32)

    @pl.when(k == pl.num_programs(1) - 1)
    def _():
        o_ref[...] = (acc_ref[...] + b2_ref[...].astype(jnp.float32)
                      ).astype(o_ref.dtype)


# ---------------------------------------------------------------------------
# Sizing / spec helpers
# ---------------------------------------------------------------------------

def _round_up(x, m):
    return -(-x // m) * m


def _round_rows(r, n_rows):
    """Round a row-tile candidate: prefer multiples of 256 (full MXU pass on
    v6e/v7x, also a multiple of 128 for v5e), fall back to multiples of 8."""
    n_up8 = _round_up(n_rows, 8)
    if r >= n_up8:
        return n_up8
    if r >= 256:
        return (r // 256) * 256
    return max(8, (r // 8) * 8)


def _spec(block_shape, index_map, *, buffers=None):
    """BlockSpec helper. buffers=1 single-buffers constant-index (resident)
    blocks so the pipeliner does not silently double their VMEM footprint."""
    if buffers is not None and hasattr(pl, "Buffered"):
        try:
            return pl.BlockSpec(block_shape, index_map,
                                pipeline_mode=pl.Buffered(buffers))
        except TypeError:           # older jax without pipeline_mode kwarg
            pass
    return pl.BlockSpec(block_shape, index_map)


def _pick_block_rows(n_rows, d_model, d_ff, d_out, x_bytes, avail_bytes):
    """Largest row tile fitting the VMEM left over after resident weights."""
    # Per row: double-buffered x/out tiles (native dtype) + f32 hidden/output
    # temporaries produced by the compute.
    per_row = 2 * (d_model + d_out) * x_bytes + 4 * (d_ff + d_out)
    cap = max(8, avail_bytes // max(per_row, 1))
    cap = min(cap, 512)   # ~85% of HBM roofline at half the VMEM of 1024 rows
    return _round_rows(int(cap), n_rows)


def _pick_ff_tiling(n_rows, d_model, d_ff, d_out, x_bytes, w_bytes, budget):
    """Row / d_ff-panel sizes for the streaming (weights-don't-fit) fallback."""
    d_ff_128 = _round_up(d_ff, 128)
    ff_candidates = [c for c in (4096, 2048, 1024, 512, 256, 128)
                     if c <= d_ff_128] or [d_ff_128]

    def plan(br, bff):
        return (2 * br * (d_model + d_out) * x_bytes          # x / out tiles (2-buf)
                + 4 * br * (d_out + bff)                      # f32 acc + hidden temp
                + 2 * w_bytes * (d_model + d_out + 1) * bff   # W1/W2/b1 panels (2-buf)
                + w_bytes * d_out)                            # b2

    for rows in (512, 256, 128, 64, 32, 16, 8):
        br = _round_rows(rows, n_rows)
        for bff in ff_candidates:
            p = plan(br, bff)
            if p <= budget:
                return br, bff, p
    br = _round_rows(8, n_rows)
    return br, 128, plan(br, 128)


# ---------------------------------------------------------------------------
# Wrapper
# ---------------------------------------------------------------------------

def positionwise_feed_forward(x, w1, b1, w2, b2, *,
                              vmem_budget_bytes=_DEFAULT_VMEM_BUDGET,
                              force_ff_tiled=False):
    """JAX/Pallas equivalent of PositionwiseFeedForward_11.forward (eval mode).

    x : (..., d_model)   any leading dims (e.g. (N, L, d_model))
    w1: (d_model, d_ff)   b1: (d_ff,)
    w2: (d_ff, d_out)     b2: (d_out,)   with d_out = d_model // 2
    """
    orig_shape = x.shape
    d_model = orig_shape[-1]
    d_ff = w1.shape[1]
    d_out = w2.shape[1]

    x2 = x.reshape(-1, d_model)          # native dtype, no wrapper pad/cast
    n_rows = x2.shape[0]

    x_bytes = jnp.dtype(x.dtype).itemsize
    w_bytes = jnp.dtype(w1.dtype).itemsize

    b1_2 = b1.reshape(1, d_ff)
    b2_2 = b2.reshape(1, d_out)

    # Single-buffered resident weight + bias footprint.
    resident_bytes = w_bytes * (d_model * d_ff + d_ff * d_out + d_ff + d_out)
    use_resident = (not force_ff_tiled) and (resident_bytes <= vmem_budget_bytes // 2)

    if use_resident:
        block_rows = _pick_block_rows(n_rows, d_model, d_ff, d_out, x_bytes,
                                      vmem_budget_bytes - resident_bytes)
        # Ragged last row block: Pallas pads the read and masks the write; rows
        # are independent, so padded rows never contaminate valid ones.  (Do
        # not add cross-row reductions inside the kernel.)
        grid_m = pl.cdiv(n_rows, block_rows)
        plan_bytes = (resident_bytes
                      + block_rows * (2 * (d_model + d_out) * x_bytes
                                      + 4 * (d_ff + d_out)))
        vmem_limit = int(min(max(32 * _MIB, plan_bytes * 3 // 2),
                             max(vmem_budget_bytes, 64 * _MIB)))

        out = pl.pallas_call(
            _ffn_kernel_resident,
            out_shape=jax.ShapeDtypeStruct((n_rows, d_out), x.dtype),
            grid_spec=pltpu.PrefetchScalarGridSpec(
                num_scalar_prefetch=0,
                grid=(grid_m,),
                in_specs=[
                    pl.BlockSpec((block_rows, d_model), lambda i: (i, 0)),
                    _spec((d_model, d_ff), lambda i: (0, 0), buffers=1),
                    _spec((1, d_ff), lambda i: (0, 0), buffers=1),
                    _spec((d_ff, d_out), lambda i: (0, 0), buffers=1),
                    _spec((1, d_out), lambda i: (0, 0), buffers=1),
                ],
                # NOTE: when d_out < 128 the final stores are masked (vst.msk);
                # kept as-is so the output layout matches the module exactly.
                out_specs=pl.BlockSpec((block_rows, d_out), lambda i: (i, 0)),
            ),
            compiler_params=pltpu.CompilerParams(
                dimension_semantics=("parallel",),
                vmem_limit_bytes=vmem_limit,
            ),
        )(x2, w1, b1_2, w2, b2_2)
    else:
        # Fallback: weights too large to keep resident — tile d_ff as a
        # reduction grid axis and stream W1/W2 panels.
        block_rows, block_ff, plan_bytes = _pick_ff_tiling(
            n_rows, d_model, d_ff, d_out, x_bytes, w_bytes, vmem_budget_bytes)

        d_ff_pad = _round_up(d_ff, block_ff)
        if d_ff_pad != d_ff:
            pad = d_ff_pad - d_ff     # zero pad contributes exactly 0
            w1 = jnp.pad(w1, ((0, 0), (0, pad)))
            b1_2 = jnp.pad(b1_2, ((0, 0), (0, pad)))
            w2 = jnp.pad(w2, ((0, pad), (0, 0)))

        grid_m = pl.cdiv(n_rows, block_rows)
        grid_k = d_ff_pad // block_ff
        vmem_limit = int(min(max(32 * _MIB, plan_bytes * 3 // 2),
                             max(vmem_budget_bytes, 64 * _MIB)))

        out = pl.pallas_call(
            _ffn_kernel_ff_tiled,
            out_shape=jax.ShapeDtypeStruct((n_rows, d_out), x.dtype),
            grid_spec=pltpu.PrefetchScalarGridSpec(
                num_scalar_prefetch=0,
                grid=(grid_m, grid_k),
                in_specs=[
                    pl.BlockSpec((block_rows, d_model), lambda i, k: (i, 0)),
                    pl.BlockSpec((d_model, block_ff), lambda i, k: (0, k)),
                    pl.BlockSpec((1, block_ff), lambda i, k: (0, k)),
                    pl.BlockSpec((block_ff, d_out), lambda i, k: (k, 0)),
                    _spec((1, d_out), lambda i, k: (0, 0), buffers=1),
                ],
                out_specs=pl.BlockSpec((block_rows, d_out), lambda i, k: (i, 0)),
                scratch_shapes=[pltpu.VMEM((block_rows, d_out), jnp.float32)],
            ),
            compiler_params=pltpu.CompilerParams(
                dimension_semantics=("parallel", "arbitrary"),
                vmem_limit_bytes=vmem_limit,
            ),
        )(x2, w1, b1_2, w2, b2_2)

    return out.reshape(orig_shape[:-1] + (d_out,))


def _reference(x, w1, b1, w2, b2):
    """Pure-JAX reference mirroring the PyTorch module (eval mode)."""
    h = jnp.maximum(jnp.dot(x, w1, precision="highest") + b1, 0.0)
    return jnp.dot(h, w2, precision="highest") + b2


if __name__ == "__main__":
    key = jax.random.PRNGKey(0)
    N, L = 2, 8
    d_model, d_ff = 32, 64
    d_out = d_model // 2

    kx, k1, k2, k3, k4 = jax.random.split(key, 5)
    x = jax.random.normal(kx, (N, L, d_model), dtype=jnp.float32)
    w1 = jax.random.normal(k1, (d_model, d_ff), dtype=jnp.float32) / jnp.sqrt(d_model)
    b1 = jax.random.normal(k2, (d_ff,), dtype=jnp.float32) * 0.1
    w2 = jax.random.normal(k3, (d_ff, d_out), dtype=jnp.float32) / jnp.sqrt(d_ff)
    b2 = jax.random.normal(k4, (d_out,), dtype=jnp.float32) * 0.1

    ref = _reference(x, w1, b1, w2, b2)

    # Resident-weights path.
    out = positionwise_feed_forward(x, w1, b1, w2, b2)
    jax.block_until_ready(out)
    assert out.shape == (N, L, d_out), out.shape
    assert jnp.allclose(out, ref, rtol=1e-3, atol=1e-3), float(
        jnp.max(jnp.abs(out - ref)))

    # Ragged row count (last block masked by Pallas, no wrapper pad).
    x_odd = x.reshape(-1, d_model)[:15].reshape(3, 5, d_model)
    out_odd = positionwise_feed_forward(x_odd, w1, b1, w2, b2)
    jax.block_until_ready(out_odd)
    ref_odd = _reference(x_odd, w1, b1, w2, b2)
    assert out_odd.shape == (3, 5, d_out), out_odd.shape
    assert jnp.allclose(out_odd, ref_odd, rtol=1e-3, atol=1e-3), float(
        jnp.max(jnp.abs(out_odd - ref_odd)))

    # d_ff-tiled fallback path (used when weights exceed the VMEM budget).
    out_ff = positionwise_feed_forward(x, w1, b1, w2, b2, force_ff_tiled=True)
    jax.block_until_ready(out_ff)
    assert jnp.allclose(out_ff, ref, rtol=1e-3, atol=1e-3), float(
        jnp.max(jnp.abs(out_ff - ref)))

    print("KERNEL_OK")
</pallas_src>

<mosaic_0001>
module attributes {stable_mosaic.version = 11 : i64} {
  func.func @_ffn_kernel_resident(%arg0: i32, %arg1: memref<16x32xf32, #tpu.memory_space<vmem>>, %arg2: memref<32x64xf32, #tpu.memory_space<vmem>>, %arg3: memref<1x64xf32, #tpu.memory_space<vmem>>, %arg4: memref<64x16xf32, #tpu.memory_space<vmem>>, %arg5: memref<1x16xf32, #tpu.memory_space<vmem>>, %arg6: memref<16x16xf32, #tpu.memory_space<vmem>>) attributes {dimension_semantics = [#tpu.dimension_semantics<parallel>], iteration_bounds = array<i64: 1>, scalar_prefetch = 0 : i64, scratch_operands = 0 : i64, tpu.core_type = #tpu.core_type<tc>, window_params = [{transform_indices = @transform_0, window_bounds = array<i64: 16, 32>}, {pipeline_mode = #tpu.pipeline_mode<synchronous>, transform_indices = @transform_1, window_bounds = array<i64: 32, 64>}, {pipeline_mode = #tpu.pipeline_mode<synchronous>, transform_indices = @transform_2, window_bounds = array<i64: 1, 64>}, {pipeline_mode = #tpu.pipeline_mode<synchronous>, transform_indices = @transform_3, window_bounds = array<i64: 64, 16>}, {pipeline_mode = #tpu.pipeline_mode<synchronous>, transform_indices = @transform_4, window_bounds = array<i64: 1, 16>}, {transform_indices = @transform_5, window_bounds = array<i64: 16, 16>}]} {
    %c0 = arith.constant 0 : index
    %c0_0 = arith.constant 0 : index
    %0 = vector.load %arg1[%c0, %c0_0] : memref<16x32xf32, #tpu.memory_space<vmem>>, vector<16x32xf32>
    %c0_1 = arith.constant 0 : index
    %c0_2 = arith.constant 0 : index
    %1 = vector.load %arg2[%c0_1, %c0_2] : memref<32x64xf32, #tpu.memory_space<vmem>>, vector<32x64xf32>
    %cst = arith.constant dense<0.000000e+00> : vector<16x64xf32>
    %2 = tpu.matmul %0, %1, %cst {dimension_numbers = #tpu.dot_dimension_numbers<[1], [0], [0], [1], [0, 0, 1, 1], [], []>} : vector<16x32xf32>, vector<32x64xf32>, vector<16x64xf32> -> vector<16x64xf32>
    %c0_3 = arith.constant 0 : index
    %c0_4 = arith.constant 0 : index
    %3 = vector.load %arg3[%c0_3, %c0_4] : memref<1x64xf32, #tpu.memory_space<vmem>>, vector<1x64xf32>
    %4 = vector.broadcast %3 : vector<1x64xf32> to vector<16x64xf32>
    %5 = arith.addf %2, %4 : vector<16x64xf32>
    %cst_5 = arith.constant 0.000000e+00 : f32
    %6 = vector.broadcast %cst_5 : f32 to vector<16x64xf32>
    %7 = arith.maximumf %5, %6 : vector<16x64xf32>
    %c0_6 = arith.constant 0 : index
    %c0_7 = arith.constant 0 : index
    %8 = vector.load %arg4[%c0_6, %c0_7] : memref<64x16xf32, #tpu.memory_space<vmem>>, vector<64x16xf32>
    %cst_8 = arith.constant dense<0.000000e+00> : vector<16x16xf32>
    %9 = tpu.matmul %7, %8, %cst_8 {dimension_numbers = #tpu.dot_dimension_numbers<[1], [0], [0], [1], [0, 0, 1, 1], [], []>} : vector<16x64xf32>, vector<64x16xf32>, vector<16x16xf32> -> vector<16x16xf32>
    %c0_9 = arith.constant 0 : index
    %c0_10 = arith.constant 0 : index
    %10 = vector.load %arg5[%c0_9, %c0_10] : memref<1x16xf32, #tpu.memory_space<vmem>>, vector<1x16xf32>
    %11 = vector.broadcast %10 : vector<1x16xf32> to vector<16x16xf32>
    %12 = arith.addf %9, %11 : vector<16x16xf32>
    %c0_11 = arith.constant 0 : index
    %c0_12 = arith.constant 0 : index
    %13 = vector.load %arg6[%c0_11, %c0_12] : memref<16x16xf32, #tpu.memory_space<vmem>>, vector<16x16xf32>
    tpu.vector_store %arg6[%c0_11, %c0_12], %12 {strides = array<i32>} : memref<16x16xf32, #tpu.memory_space<vmem>>, vector<16x16xf32>,
    return
  }
  func.func @transform_0(%arg0: i32) -> (i32, i32) {
    %c0_i32 = arith.constant 0 : i32
    %c0_i32_0 = arith.constant 0 : i32
    return %arg0, %c0_i32 : i32, i32
  }
  func.func @transform_1(%arg0: i32) -> (i32, i32) {
    %c0_i32 = arith.constant 0 : i32
    %c0_i32_0 = arith.constant 0 : i32
    %c0_i32_1 = arith.constant 0 : i32
    return %c0_i32, %c0_i32_0 : i32, i32
  }
  func.func @transform_2(%arg0: i32) -> (i32, i32) {
    %c0_i32 = arith.constant 0 : i32
    %c0_i32_0 = arith.constant 0 : i32
    %c0_i32_1 = arith.constant 0 : i32
    return %c0_i32, %c0_i32_0 : i32, i32
  }
  func.func @transform_3(%arg0: i32) -> (i32, i32) {
    %c0_i32 = arith.constant 0 : i32
    %c0_i32_0 = arith.constant 0 : i32
    %c0_i32_1 = arith.constant 0 : i32
    return %c0_i32, %c0_i32_0 : i32, i32
  }
  func.func @transform_4(%arg0: i32) -> (i32, i32) {
    %c0_i32 = arith.constant 0 : i32
    %c0_i32_0 = arith.constant 0 : i32
    %c0_i32_1 = arith.constant 0 : i32
    return %c0_i32, %c0_i32_0 : i32, i32
  }
  func.func @transform_5(%arg0: i32) -> (i32, i32) {
    %c0_i32 = arith.constant 0 : i32
    %c0_i32_0 = arith.constant 0 : i32
    return %arg0, %c0_i32 : i32, i32
  }
}

</mosaic_0001>

<bundles_post_ra>
// kernel: tpu_custom_call.1
= control target key start
LH: loop header
LB: loop body
LE: loop exit
PB: predicated region body
PF: predicated region fallthrough
CT: control target
= control target key end

     0   :  { %vm34_vm0 = vcmask 261120   ;;  %s432_s0 = inlined_call_operand.vmem [shape: f32[16,32], index: 0, kind: input, shape index: {}]   ;;  %s433_s1 = inlined_call_operand.vmem [shape: f32[32,64], index: 1, kind: input, shape index: {}]   ;;  %s434_s2 = inlined_call_operand.vmem [shape: f32[1,64], index: 2, kind: input, shape index: {}]   ;;  %s435_s3 = inlined_call_operand.vmem [shape: f32[64,16], index: 3, kind: input, shape index: {}]   ;;  %s436_s4 = inlined_call_operand.vmem [shape: f32[1,16], index: 4, kind: input, shape index: {}]   ;;  %s437_s5 = inlined_call_operand.hbm [shape: f32[16,16], index: 5, kind: output, shape index: {}]  }
   0x1   :  { %v23_v0 = vld [vmem:[%s433_s1] sm:$0xff]  ;;  %v24_v1 = vld [vmem:[%s433_s1 + $0x8] sm:$0xff]  ;;  %v25_v2 = vld [vmem:[%s433_s1 + $0x10] sm:$0xff] }
   0x2   :  { %v286_v3 = vpack.c.bf16 %v24_v1, %v23_v0  ;;  %v26_v4 = vld [vmem:[%s433_s1 + $0x18] sm:$0xff]  ;;  %v21_v5 = vld [vmem:[%s432_s0] sm:$0xff]  ;;  %v119_v8 = vld [vmem:[%s435_s3 + $0x8] sm:$0xff] }
   0x3   :  { %v290_v6 = vpack.c.bf16 %v26_v4, %v25_v2  ;;  %264 = vmatprep.mubr.msk.f32.mxu0 %vm34_vm0, %v21_v5  ;;  %v118_v7 = vld [vmem:[%s435_s3] sm:$0xff]  ;;  %v120_v9 = vld [vmem:[%s435_s3 + $0x10] sm:$0xff]  ;;  %v121_v11 = vld [vmem:[%s435_s3 + $0x18] sm:$0xff] }
   0x4   :  { %287 = vmatprep.subr.bf16.mxu0 %v286_v3  ;;  %v294_v10 = vpack.c.bf16 %v119_v8, %v118_v7  ;;  %v298_v12 = vpack.c.bf16 %v121_v11, %v120_v9  ;;  %v122_v13 = vld [vmem:[%s435_s3 + $0x20] sm:$0xff]  ;;  %v123_v14 = vld [vmem:[%s435_s3 + $0x28] sm:$0xff] }
   0x5   :  { %289 = vmatpush3.bf16.msra.mxu0 %v286_v3 }
   0x6   :  { %10 = vsyncpa [#allocation3], 0  ;;  %291 = vmatprep.subr.bf16.mxu0 %v290_v6  ;;  %295 = vmatprep.subr.bf16.mxu1 %v294_v10  ;;  %v302_v15 = vpack.c.bf16 %v123_v14, %v122_v13  ;;  %v22_v16 = vld [vmem:[%s432_s0 + $0x8] sm:$0xff]  ;;  %v124_v17 = vld [vmem:[%s435_s3 + $0x30] sm:$0xff]  ;;  %vm133_vm1 = vcmask 523264   ;;  %vm215_vm2 = vcmask 130048  }
   0x7   :  { %297 = vmatpush3.bf16.msra.mxu1 %v294_v10  ;;  %v125_v18 = vld [vmem:[%s435_s3 + $0x38] sm:$0xff]  ;;  %v234_v20 = vld [vmem:[%s434_s2] ss:$0 sm:$0xff]  ;;  %s337_s3 = smov [#allocation2]  }
   0x8   :  { %299 = vmatprep.subr.bf16.mxu1 %v298_v12  ;;  %v306_v19 = vpack.c.bf16 %v125_v18, %v124_v17  ;;  %v237_v27 = vld [vmem:[%s436_s4] ss:$0 sm:$0xff]  ;;  %s223_s23 = sshll.u32 %s337_s3, 4  ;;  %s224_s23 = int_to_ptr.vmem [resolvable:$true] %s223_s23 }
   0x9   :  { %293 = vmatpush3.bf16.msra.mxu0 %v290_v6  ;;  %s313_s2 = scalar_lea.vmem %s224_s23, 256  ;;  %p318_p1 = scmp.lt.s32.totalorder %s224_s23, %s224_s23 }
   0xa   :  { %p314_p0 = scmp.ne.s32.totalorder %s224_s23, %s313_s2  ;;  %p319_p2 = scmp.lt.s32.totalorder %s313_s2, %s313_s2 }
   0xb   :  { %301 = vmatpush3.bf16.msra.mxu1 %v298_v12 }
   0xc   :  { %265 = vmatmul.mubr.msk.f32.vlgmr.msra.gmra.mrb[0].mxu0 %vm34_vm0, %v22_v16  ;;  %303 = vmatprep.subr.bf16.mxu1 %v302_v15  ;;  %p320_p3 = por %p319_p2, %p318_p1 }
   0xe   :  { %p321_p4 = pnand %p320_p3, %p314_p0 }
   0xf   :  { %305 = vmatpush3.bf16.msra.mxu1 %v302_v15 }
  0x10   :  { %307 = vmatprep.subr.bf16.mxu1 %v306_v19 }
  0x13   :  { %309 = vmatpush3.bf16.msra.mxu1 %v306_v19 }
  0xdf   :  { %v266_v21 = vpop.f32.mrb[0].mxu0 }
  0xe0   :  { %v113_v22 = vadd.f32 %v266_v21, %v234_v20  ;;  %v107_v23 = vpop.f32.mrb[1].mxu0 }
  0xe1   :  { %v108_v24 = vadd.f32 %v234_v20, %v107_v23 }
  0xe2   :  { %v117_v26 = vmax.f32 %v113_v22, 0.0 }
  0xe3   :  { %v116_v25 = vmax.f32 %v108_v24, 0.0 }
  0xe5   :  { %283 = vmatprep.mubr.msk.f32.mxu1 %vm133_vm1, %v116_v25 }
  0xe6   :  { %284 = vmatmul.mubr.msk.f32.vlgmr.msra.gmra.mrb[0].mxu1 %vm133_vm1, %v117_v26 }
 0x1b9   :  { %v285_v28 = vpop.f32.mrb[0].mxu1 }
 0x1ba   :  { %v212_v29 = vadd.f32 %v285_v28, %v237_v27  ;;  %v206_v30 = vpop.f32.mrb[1].mxu1 }
 0x1bb   :  { %v207_v31 = vadd.f32 %v237_v27, %v206_v30 }
 0x1bc   :  { %217 = vst.msk [vmem:[#allocation2 + $0x8] sm:$0xff] %vm215_vm2, %v212_v29 }
 0x1bd   :  { %216 = vst.msk [vmem:[#allocation2] sm:$0xff] %vm215_vm2, %v207_v31 }
 0x1be   :  { %324 = shalt.err (!%p321_p4)
}
 0x1bf   :  { %s325_s4 = scalar_lea.hbm %s437_s5, 256 }
 0x1c0   :  { %p326_p5 = scmp.ne.s32.totalorder %s437_s5, %s325_s4  ;;  %p329_p6 = scmp.lt.u32.totalorder %s325_s4, %s437_s5 }
 0x1c2   :  { %p331_p7 = pnand %p329_p6, %p326_p5 }
 0x1c4   :  { %334 = shalt.err (!%p331_p7)
}
 0x1c5   :  { %s338_s30 = smov 128   ;;  %s339_s6 = smov 8  }
 0x1c6   :  { %229 = dma.vmem_to_hbm [thread:$0]  %s224_s23, 256, %s437_s5, [#allocation3], %s338_s30, %s338_s30, %s339_s6  }
 0x1c7   :  { %335 = dma.done.wait [#allocation3], 256  }
 0x1c8   :  { %336 = vsyncadd [#allocation3], 4294967040 }
 0x1c9   :  { %233 = vsyncpa [#allocation3], 1 }

</bundles_post_ra>
